<compile_context>
chip_gen: v6e
topology: v6e:2x2x1
jax: 0.10.0
libtpu: 0.0.40
codegen_flags: <defaults>
</compile_context>

<pallas_src>
import functools
import math

import jax
import jax.numpy as jnp
from jax.experimental import pallas as pl
from jax.experimental.pallas import tpu as pltpu


def analytic_signal(x):
    """Hilbert analytic signal via FFT.  x: [B, T] real."""
    # TODO(synk): FFT has no Pallas TPU equivalent; the analytic signal stays in plain JAX.
    n = x.shape[-1]
    xf = jnp.fft.fft(x, axis=-1)
    h = jnp.zeros((n,), dtype=xf.dtype)
    if n % 2 == 0:
        h = h.at[0].set(1.0).at[n // 2].set(1.0).at[1:n // 2].set(2.0)
    else:
        h = h.at[0].set(1.0).at[1:(n + 1) // 2].set(2.0)
    return jnp.fft.ifft(xf * h, axis=-1)


def _aisbett_kernel(iq_ref, s_ref, w_ref, o_ref, *, bt, t_real, pad_left,
                    tb, n_blocks, eps):
    """One grid step: Bt waveform rows -> pooled mean/var of the 3 Aisbett features."""
    I = iq_ref[0]                     # [Bt, T_pad]
    Q = iq_ref[1]                     # [Bt, T_pad]
    t_pad = I.shape[-1]

    # torch.gradient(dim=-1, edge_order=1) on the *real* samples, which live at
    # padded positions [pad_left, pad_left + t_real).  Padded positions hold
    # I = Q = 0, so their (arbitrary) gradients never reach the features.
    idx = jax.lax.broadcasted_iota(jnp.int32, I.shape, 1)
    first = idx == pad_left
    last = idx == pad_left + t_real - 1

    def grad1d(x):
        x_next = pltpu.roll(x, t_pad - 1, axis=1)   # x[i + 1]  (wrap lands on zero padding)
        x_prev = pltpu.roll(x, 1, axis=1)           # x[i - 1]
        g = (x_next - x_prev) * 0.5                 # interior: central difference
        g = jnp.where(first, x_next - x, g)         # left edge: one-sided
        g = jnp.where(last, x - x_prev, g)          # right edge: one-sided
        return g

    gI = grad1d(I)
    gQ = grad1d(Q)

    s_mat = s_ref[...]                # [Tb, Cb]  chunk partial-sum matrix

    # Stage 1: stream the time axis in Tb-sized, lane-aligned blocks; each block
    # does ONE fused matmul whose M dimension stacks all 6 channels x Bt rows.
    # TODO(synk): for very long sequences (T >> 100k) this unrolled loop / full-row
    # residency should become a time grid axis with explicit halo handling.
    parts = []
    for k in range(n_blocks):
        sl = slice(k * tb, (k + 1) * tb)
        i_b, q_b = I[:, sl], Q[:, sl]
        gi_b, gq_b = gI[:, sl], gQ[:, sl]
        f1 = i_b * i_b + q_b * q_b                 # A^2
        f2 = i_b * gi_b + q_b * gq_b               # A * A'
        f3 = i_b * gq_b - q_b * gi_b               # A^2 * theta'
        fb = jnp.concatenate(
            [f1, f2, f3, f1 * f1, f2 * f2, f3 * f3], axis=0)     # [6*Bt, Tb]
        parts.append(jnp.dot(fb, s_mat, preferred_element_type=jnp.float32))
    p = parts[0] if n_blocks == 1 else jnp.concatenate(parts, axis=1)  # [6*Bt, C_total]

    # Stage 2: banded combine of chunk sums into window means (scaled by 1/window).
    pooled = jnp.dot(p, w_ref[...], preferred_element_type=jnp.float32)  # [6*Bt, F_pad]

    for c in range(3):
        m = pooled[c * bt:(c + 1) * bt]            # E[f_c]
        msq = pooled[(c + 3) * bt:(c + 4) * bt]    # E[f_c^2]
        o_ref[0, c] = m
        o_ref[0, c + 3] = jnp.maximum(msq - m * m, eps)


def aisbett_feature_extractor_mean_var(waveform, *, hop_length=128,
                                       window_length=512, eps=1e-8,
                                       batch_tile=8):
    """Forward pass matching the PyTorch module. Returns [B, time_frames, 6]."""
    if waveform.ndim == 1:
        waveform = waveform[None, :]
    if waveform.ndim > 2:
        waveform = jnp.squeeze(waveform, axis=-1)
    waveform = waveform.astype(jnp.float32)
    B, T = waveform.shape

    analytic = analytic_signal(waveform)
    I = jnp.real(analytic).astype(jnp.float32)
    Q = jnp.imag(analytic).astype(jnp.float32)

    padding = max(0, (window_length - 1) // 2)
    F = (T + 2 * padding - window_length) // hop_length + 1
    if F < 1:
        raise ValueError("sequence too short for the requested pooling window")

    # Pooling factorisation: chunk = gcd(hop, window) so every window is a whole
    # number of chunks and every window start is chunk-aligned.
    chunk = math.gcd(hop_length, window_length)
    hop_c = hop_length // chunk                     # chunks per hop
    win_c = window_length // chunk                  # chunks per window
    cb = max(1, min(64, 2048 // chunk))             # chunks produced per stage-1 block
    tb = chunk * cb                                 # stage-1 block length (samples)

    needed = max(padding + T, (F - 1) * hop_length + window_length)
    n_blocks = -(-needed // tb)
    t_pad = n_blocks * tb
    c_total = n_blocks * cb
    f_pad = -(-F // 128) * 128                      # lane-dense output frames

    # Batch tiling: Bt rows per grid step (8 fills the sublanes / MXU M-dim).
    if B <= batch_tile:
        bt = B
    else:
        bt = max(8, (batch_tile // 8) * 8)
    b_pad = -(-B // bt) * bt
    n_bt = b_pad // bt

    def _pad(x):
        return jnp.pad(x, ((0, b_pad - B), (padding, t_pad - padding - T)))

    iq = jnp.stack([_pad(I), _pad(Q)], axis=0)      # [2, B_pad, T_pad]

    # Stage-1 matrix: sums groups of `chunk` consecutive samples.
    jj = jnp.arange(tb)[:, None]
    ci = jnp.arange(cb)[None, :]
    s_mat = ((jj // chunk) == ci).astype(jnp.float32)             # [Tb, Cb]

    # Stage-2 matrix: banded window combine, with 1/window_length folded in.
    cc = jnp.arange(c_total)[:, None]
    ff = jnp.arange(f_pad)[None, :]
    w_band = (((cc >= ff * hop_c) & (cc < ff * hop_c + win_c) & (ff < F))
              .astype(jnp.float32) / float(window_length))        # [C_total, F_pad]

    # VMEM budget: double-buffered IQ block + gradients/temps + small matrices.
    row_bytes = 4 * bt * t_pad
    est = (4 * row_bytes + 6 * row_bytes + 32 * bt * tb
           + 8 * (tb * cb + c_total * f_pad + 6 * bt * f_pad))
    vmem_limit = int(min(max(2 * est, 32 * 1024 * 1024), 100 * 1024 * 1024))

    kernel = functools.partial(
        _aisbett_kernel, bt=bt, t_real=T, pad_left=padding,
        tb=tb, n_blocks=n_blocks, eps=float(eps))

    out = pl.pallas_call(
        kernel,
        out_shape=jax.ShapeDtypeStruct((n_bt, 6, bt, f_pad), jnp.float32),
        grid_spec=pltpu.PrefetchScalarGridSpec(
            num_scalar_prefetch=0,
            grid=(n_bt,),
            in_specs=[
                pl.BlockSpec((2, bt, t_pad), lambda g: (0, g, 0)),
                pl.BlockSpec((tb, cb), lambda g: (0, 0)),
                pl.BlockSpec((c_total, f_pad), lambda g: (0, 0)),
            ],
            out_specs=pl.BlockSpec((1, 6, bt, f_pad), lambda g: (g, 0, 0, 0)),
        ),
        compiler_params=pltpu.CompilerParams(
            dimension_semantics=("parallel",),
            vmem_limit_bytes=vmem_limit,
        ),
    )(iq, s_mat, w_band)

    # [n_bt, 6, Bt, F_pad] -> [B, F, 6]  (channels 0..2 = means, 3..5 = variances)
    out = out[:, :, :, :F]
    out = jnp.transpose(out, (0, 2, 3, 1)).reshape(b_pad, F, 6)
    return out[:B]


def _reference_forward(waveform, hop_length, window_length, eps):
    """Pure-JAX reference mirroring the PyTorch module (validation only)."""
    analytic = analytic_signal(waveform)
    I = jnp.real(analytic).astype(jnp.float32)
    Q = jnp.imag(analytic).astype(jnp.float32)

    def grad1d(x):
        interior = (x[:, 2:] - x[:, :-2]) * 0.5
        left = x[:, 1:2] - x[:, 0:1]
        right = x[:, -1:] - x[:, -2:-1]
        return jnp.concatenate([left, interior, right], axis=1)

    gI = grad1d(I)
    gQ = grad1d(Q)
    f1 = I * I + Q * Q
    f2 = I * gI + Q * gQ
    f3 = I * gQ - Q * gI
    feats = jnp.stack([f1, f2, f3], axis=1)                       # [B, 3, T]

    padding = max(0, (window_length - 1) // 2)
    T = waveform.shape[-1]
    F = (T + 2 * padding - window_length) // hop_length + 1
    fp = jnp.pad(feats, ((0, 0), (0, 0), (padding, padding)))

    def pool(x):
        cols = [x[:, :, f * hop_length:f * hop_length + window_length].mean(axis=-1)
                for f in range(F)]
        return jnp.stack(cols, axis=-1)                           # [B, 3, F]

    mean = pool(fp)
    mean_sq = pool(fp * fp)
    var = jnp.maximum(mean_sq - mean * mean, eps)
    comb = jnp.concatenate([mean, var], axis=1)                   # [B, 6, F]
    return jnp.transpose(comb, (0, 2, 1))                         # [B, F, 6]


if __name__ == "__main__":
    key = jax.random.PRNGKey(0)
    B, T = 2, 64
    hop_length, window_length, eps = 8, 16, 1e-8   # small-scale version of (128, 512)
    waveform = jax.random.normal(key, (B, T), dtype=jnp.float32)

    out = aisbett_feature_extractor_mean_var(
        waveform, hop_length=hop_length, window_length=window_length, eps=eps)
    out = jax.block_until_ready(out)

    padding = (window_length - 1) // 2
    expected_frames = (T + 2 * padding - window_length) // hop_length + 1
    assert out.shape == (B, expected_frames, 6), out.shape
    assert bool(jnp.all(jnp.isfinite(out)))

    ref = _reference_forward(waveform, hop_length, window_length, eps)
    max_err = float(jnp.max(jnp.abs(out - ref)))
    assert max_err < 1e-3, f"mismatch vs pure-JAX reference: {max_err}"

    print("KERNEL_OK")
</pallas_src>

<mosaic_0001>
module attributes {stable_mosaic.version = 11 : i64} {
  func.func @_aisbett_kernel(%arg0: i32, %arg1: memref<2x2x512xf32, #tpu.memory_space<vmem>>, %arg2: memref<512x64xf32, #tpu.memory_space<vmem>>, %arg3: memref<64x128xf32, #tpu.memory_space<vmem>>, %arg4: memref<1x6x2x128xf32, #tpu.memory_space<vmem>>) attributes {dimension_semantics = [#tpu.dimension_semantics<parallel>], iteration_bounds = array<i64: 1>, scalar_prefetch = 0 : i64, scratch_operands = 0 : i64, tpu.core_type = #tpu.core_type<tc>, window_params = [{transform_indices = @transform_0, window_bounds = array<i64: 2, 2, 512>}, {pipeline_mode = #tpu.pipeline_mode<synchronous>, transform_indices = @transform_1, window_bounds = array<i64: 512, 64>}, {pipeline_mode = #tpu.pipeline_mode<synchronous>, transform_indices = @transform_2, window_bounds = array<i64: 64, 128>}, {transform_indices = @transform_3, window_bounds = array<i64: 1, 6, 2, 128>}]} {
    %c0 = arith.constant 0 : index
    %c0_0 = arith.constant 0 : index
    %c0_1 = arith.constant 0 : index
    %0 = vector.load %arg1[%c0, %c0_0, %c0_1] : memref<2x2x512xf32, #tpu.memory_space<vmem>>, vector<1x2x512xf32>
    %1 = vector.shape_cast %0 : vector<1x2x512xf32> to vector<2x512xf32>
    %c1 = arith.constant 1 : index
    %c0_2 = arith.constant 0 : index
    %c0_3 = arith.constant 0 : index
    %2 = vector.load %arg1[%c1, %c0_2, %c0_3] : memref<2x2x512xf32, #tpu.memory_space<vmem>>, vector<1x2x512xf32>
    %3 = vector.shape_cast %2 : vector<1x2x512xf32> to vector<2x512xf32>
    %4 = tpu.iota {dimensions = array<i32: 1>} : vector<2x512xi32>
    %c7_i32 = arith.constant 7 : i32
    %5 = vector.broadcast %c7_i32 : i32 to vector<2x512xi32>
    %6 = arith.cmpi eq, %4, %5 : vector<2x512xi32>
    %c70_i32 = arith.constant 70 : i32
    %7 = vector.broadcast %c70_i32 : i32 to vector<2x512xi32>
    %8 = arith.cmpi eq, %4, %7 : vector<2x512xi32>
    %c511_i32 = arith.constant 511 : i32
    %9 = tpu.dynamic_rotate %1 by %c511_i32 dim 1 : vector<2x512xf32>, i32 -> vector<2x512xf32>
    %c1_i32 = arith.constant 1 : i32
    %10 = tpu.dynamic_rotate %1 by %c1_i32 dim 1 : vector<2x512xf32>, i32 -> vector<2x512xf32>
    %11 = arith.subf %9, %10 : vector<2x512xf32>
    %cst = arith.constant 5.000000e-01 : f32
    %12 = vector.broadcast %cst : f32 to vector<2x512xf32>
    %13 = arith.mulf %11, %12 : vector<2x512xf32>
    %14 = arith.subf %9, %1 : vector<2x512xf32>
    %15 = arith.select %6, %14, %13 : vector<2x512xi1>, vector<2x512xf32>
    %16 = arith.subf %1, %10 : vector<2x512xf32>
    %17 = arith.select %8, %16, %15 : vector<2x512xi1>, vector<2x512xf32>
    %c511_i32_4 = arith.constant 511 : i32
    %18 = tpu.dynamic_rotate %3 by %c511_i32_4 dim 1 : vector<2x512xf32>, i32 -> vector<2x512xf32>
    %c1_i32_5 = arith.constant 1 : i32
    %19 = tpu.dynamic_rotate %3 by %c1_i32_5 dim 1 : vector<2x512xf32>, i32 -> vector<2x512xf32>
    %20 = arith.subf %18, %19 : vector<2x512xf32>
    %cst_6 = arith.constant 5.000000e-01 : f32
    %21 = vector.broadcast %cst_6 : f32 to vector<2x512xf32>
    %22 = arith.mulf %20, %21 : vector<2x512xf32>
    %23 = arith.subf %18, %3 : vector<2x512xf32>
    %24 = arith.select %6, %23, %22 : vector<2x512xi1>, vector<2x512xf32>
    %25 = arith.subf %3, %19 : vector<2x512xf32>
    %26 = arith.select %8, %25, %24 : vector<2x512xi1>, vector<2x512xf32>
    %c0_7 = arith.constant 0 : index
    %c0_8 = arith.constant 0 : index
    %27 = vector.load %arg2[%c0_7, %c0_8] : memref<512x64xf32, #tpu.memory_space<vmem>>, vector<512x64xf32>
    %28 = arith.mulf %1, %1 : vector<2x512xf32>
    %29 = arith.mulf %3, %3 : vector<2x512xf32>
    %30 = arith.addf %28, %29 : vector<2x512xf32>
    %31 = arith.mulf %1, %17 : vector<2x512xf32>
    %32 = arith.mulf %3, %26 : vector<2x512xf32>
    %33 = arith.addf %31, %32 : vector<2x512xf32>
    %34 = arith.mulf %1, %26 : vector<2x512xf32>
    %35 = arith.mulf %3, %17 : vector<2x512xf32>
    %36 = arith.subf %34, %35 : vector<2x512xf32>
    %37 = arith.mulf %30, %30 : vector<2x512xf32>
    %38 = arith.mulf %33, %33 : vector<2x512xf32>
    %39 = arith.mulf %36, %36 : vector<2x512xf32>
    %40 = tpu.concatenate %30, %33, %36, %37, %38, %39 in 0 : vector<2x512xf32>, vector<2x512xf32>, vector<2x512xf32>, vector<2x512xf32>, vector<2x512xf32>, vector<2x512xf32> -> vector<12x512xf32>
    %cst_9 = arith.constant dense<0.000000e+00> : vector<12x64xf32>
    %41 = tpu.matmul %40, %27, %cst_9 {dimension_numbers = #tpu.dot_dimension_numbers<[1], [0], [0], [1], [0, 0, 1, 1], [], []>} : vector<12x512xf32>, vector<512x64xf32>, vector<12x64xf32> -> vector<12x64xf32>
    %c0_10 = arith.constant 0 : index
    %c0_11 = arith.constant 0 : index
    %42 = vector.load %arg3[%c0_10, %c0_11] : memref<64x128xf32, #tpu.memory_space<vmem>>, vector<64x128xf32>
    %cst_12 = arith.constant dense<0.000000e+00> : vector<12x128xf32>
    %43 = tpu.matmul %41, %42, %cst_12 {dimension_numbers = #tpu.dot_dimension_numbers<[1], [0], [0], [1], [0, 0, 1, 1], [], []>} : vector<12x64xf32>, vector<64x128xf32>, vector<12x128xf32> -> vector<12x128xf32>
    %44 = vector.extract_strided_slice %43 {offsets = [0, 0], sizes = [2, 128], strides = [1, 1]} : vector<12x128xf32> to vector<2x128xf32>
    %45 = vector.extract_strided_slice %43 {offsets = [6, 0], sizes = [2, 128], strides = [1, 1]} : vector<12x128xf32> to vector<2x128xf32>
    %c0_13 = arith.constant 0 : index
    %c0_14 = arith.constant 0 : index
    %c0_15 = arith.constant 0 : index
    %c0_16 = arith.constant 0 : index
    %46 = vector.load %arg4[%c0_13, %c0_14, %c0_15, %c0_16] : memref<1x6x2x128xf32, #tpu.memory_space<vmem>>, vector<1x1x2x128xf32>
    %47 = vector.shape_cast %46 : vector<1x1x2x128xf32> to vector<2x128xf32>
    %48 = vector.shape_cast %44 : vector<2x128xf32> to vector<1x1x2x128xf32>
    tpu.vector_store %arg4[%c0_13, %c0_14, %c0_15, %c0_16], %48 {strides = array<i32>} : memref<1x6x2x128xf32, #tpu.memory_space<vmem>>, vector<1x1x2x128xf32>,
    %49 = arith.mulf %44, %44 : vector<2x128xf32>
    %50 = arith.subf %45, %49 : vector<2x128xf32>
    %cst_17 = arith.constant 9.99999993E-9 : f32
    %51 = vector.broadcast %cst_17 : f32 to vector<2x128xf32>
    %52 = arith.maximumf %50, %51 : vector<2x128xf32>
    %c0_18 = arith.constant 0 : index
    %c3 = arith.constant 3 : index
    %c0_19 = arith.constant 0 : index
    %c0_20 = arith.constant 0 : index
    %53 = vector.load %arg4[%c0_18, %c3, %c0_19, %c0_20] : memref<1x6x2x128xf32, #tpu.memory_space<vmem>>, vector<1x1x2x128xf32>
    %54 = vector.shape_cast %53 : vector<1x1x2x128xf32> to vector<2x128xf32>
    %55 = vector.shape_cast %52 : vector<2x128xf32> to vector<1x1x2x128xf32>
    tpu.vector_store %arg4[%c0_18, %c3, %c0_19, %c0_20], %55 {strides = array<i32>} : memref<1x6x2x128xf32, #tpu.memory_space<vmem>>, vector<1x1x2x128xf32>,
    %56 = vector.extract_strided_slice %43 {offsets = [2, 0], sizes = [2, 128], strides = [1, 1]} : vector<12x128xf32> to vector<2x128xf32>
    %57 = vector.extract_strided_slice %43 {offsets = [8, 0], sizes = [2, 128], strides = [1, 1]} : vector<12x128xf32> to vector<2x128xf32>
    %c0_21 = arith.constant 0 : index
    %c1_22 = arith.constant 1 : index
    %c0_23 = arith.constant 0 : index
    %c0_24 = arith.constant 0 : index
    %58 = vector.load %arg4[%c0_21, %c1_22, %c0_23, %c0_24] : memref<1x6x2x128xf32, #tpu.memory_space<vmem>>, vector<1x1x2x128xf32>
    %59 = vector.shape_cast %58 : vector<1x1x2x128xf32> to vector<2x128xf32>
    %60 = vector.shape_cast %56 : vector<2x128xf32> to vector<1x1x2x128xf32>
    tpu.vector_store %arg4[%c0_21, %c1_22, %c0_23, %c0_24], %60 {strides = array<i32>} : memref<1x6x2x128xf32, #tpu.memory_space<vmem>>, vector<1x1x2x128xf32>,
    %61 = arith.mulf %56, %56 : vector<2x128xf32>
    %62 = arith.subf %57, %61 : vector<2x128xf32>
    %cst_25 = arith.constant 9.99999993E-9 : f32
    %63 = vector.broadcast %cst_25 : f32 to vector<2x128xf32>
    %64 = arith.maximumf %62, %63 : vector<2x128xf32>
    %c0_26 = arith.constant 0 : index
    %c4 = arith.constant 4 : index
    %c0_27 = arith.constant 0 : index
    %c0_28 = arith.constant 0 : index
    %65 = vector.load %arg4[%c0_26, %c4, %c0_27, %c0_28] : memref<1x6x2x128xf32, #tpu.memory_space<vmem>>, vector<1x1x2x128xf32>
    %66 = vector.shape_cast %65 : vector<1x1x2x128xf32> to vector<2x128xf32>
    %67 = vector.shape_cast %64 : vector<2x128xf32> to vector<1x1x2x128xf32>
    tpu.vector_store %arg4[%c0_26, %c4, %c0_27, %c0_28], %67 {strides = array<i32>} : memref<1x6x2x128xf32, #tpu.memory_space<vmem>>, vector<1x1x2x128xf32>,
    %68 = vector.extract_strided_slice %43 {offsets = [4, 0], sizes = [2, 128], strides = [1, 1]} : vector<12x128xf32> to vector<2x128xf32>
    %69 = vector.extract_strided_slice %43 {offsets = [10, 0], sizes = [2, 128], strides = [1, 1]} : vector<12x128xf32> to vector<2x128xf32>
    %c0_29 = arith.constant 0 : index
    %c2 = arith.constant 2 : index
    %c0_30 = arith.constant 0 : index
    %c0_31 = arith.constant 0 : index
    %70 = vector.load %arg4[%c0_29, %c2, %c0_30, %c0_31] : memref<1x6x2x128xf32, #tpu.memory_space<vmem>>, vector<1x1x2x128xf32>
    %71 = vector.shape_cast %70 : vector<1x1x2x128xf32> to vector<2x128xf32>
    %72 = vector.shape_cast %68 : vector<2x128xf32> to vector<1x1x2x128xf32>
    tpu.vector_store %arg4[%c0_29, %c2, %c0_30, %c0_31], %72 {strides = array<i32>} : memref<1x6x2x128xf32, #tpu.memory_space<vmem>>, vector<1x1x2x128xf32>,
    %73 = arith.mulf %68, %68 : vector<2x128xf32>
    %74 = arith.subf %69, %73 : vector<2x128xf32>
    %cst_32 = arith.constant 9.99999993E-9 : f32
    %75 = vector.broadcast %cst_32 : f32 to vector<2x128xf32>
    %76 = arith.maximumf %74, %75 : vector<2x128xf32>
    %c0_33 = arith.constant 0 : index
    %c5 = arith.constant 5 : index
    %c0_34 = arith.constant 0 : index
    %c0_35 = arith.constant 0 : index
    %77 = vector.load %arg4[%c0_33, %c5, %c0_34, %c0_35] : memref<1x6x2x128xf32, #tpu.memory_space<vmem>>, vector<1x1x2x128xf32>
    %78 = vector.shape_cast %77 : vector<1x1x2x128xf32> to vector<2x128xf32>
    %79 = vector.shape_cast %76 : vector<2x128xf32> to vector<1x1x2x128xf32>
    tpu.vector_store %arg4[%c0_33, %c5, %c0_34, %c0_35], %79 {strides = array<i32>} : memref<1x6x2x128xf32, #tpu.memory_space<vmem>>, vector<1x1x2x128xf32>,
    return
  }
  func.func @transform_0(%arg0: i32) -> (i32, i32, i32) {
    %c0_i32 = arith.constant 0 : i32
    %c0_i32_0 = arith.constant 0 : i32
    %c0_i32_1 = arith.constant 0 : i32
    return %c0_i32, %arg0, %c0_i32_0 : i32, i32, i32
  }
  func.func @transform_1(%arg0: i32) -> (i32, i32) {
    %c0_i32 = arith.constant 0 : i32
    %c0_i32_0 = arith.constant 0 : i32
    %c0_i32_1 = arith.constant 0 : i32
    return %c0_i32, %c0_i32_0 : i32, i32
  }
  func.func @transform_2(%arg0: i32) -> (i32, i32) {
    %c0_i32 = arith.constant 0 : i32
    %c0_i32_0 = arith.constant 0 : i32
    %c0_i32_1 = arith.constant 0 : i32
    return %c0_i32, %c0_i32_0 : i32, i32
  }
  func.func @transform_3(%arg0: i32) -> (i32, i32, i32, i32) {
    %c0_i32 = arith.constant 0 : i32
    %c0_i32_0 = arith.constant 0 : i32
    %c0_i32_1 = arith.constant 0 : i32
    %c0_i32_2 = arith.constant 0 : i32
    return %arg0, %c0_i32, %c0_i32_0, %c0_i32_1 : i32, i32, i32, i32
  }
}

</mosaic_0001>

<bundles_post_ra>
// kernel: tpu_custom_call.1
= control target key start
LH: loop header
LB: loop body
LE: loop exit
PB: predicated region body
PF: predicated region fallthrough
CT: control target
= control target key end

     0   :  { %v18_v1 = vlaneseq  ;;  %v939_v2 = vmov 1983009808   ;;  %s1360_s0 = inlined_call_operand.vmem [shape: f32[2,2,512], index: 0, kind: input, shape index: {}]   ;;  %s1361_s1 = inlined_call_operand.vmem [shape: f32[512,64], index: 1, kind: input, shape index: {}]   ;;  %s1362_s2 = inlined_call_operand.vmem [shape: f32[64,128], index: 2, kind: input, shape index: {}]   ;;  %s1363_s3 = inlined_call_operand.hbm [shape: f32[1,6,2,128], index: 3, kind: output, shape index: {}]  }
   0x1   :  { %v968_v0 = vld [vmem:[%s1360_s0] sm:$0xff]  ;;  %v34_v3 = vunpack.c.l.s4 %v939_v2 }
   0x2   :  { %8 = vsyncpa [#allocation3], 0  ;;  %v37_v4 = vshrl.u32 %v18_v1, 7  ;;  %v32_v6 = vcombine.high %v968_v0, %v968_v0  ;;  %v978_v8 = vld [vmem:[%s1360_s0 + $0x8] sm:$0xff]  ;;  %s940_s16 = smov 1   ;;  %v318_v17 = vld [vmem:[%s1361_s1 + $0x1f8] sm:$0xff] }
   0x3   :  { %v35_v5 = vunpack.c.0.s8 %v34_v3  ;;  %v145_v13 = vcombine.high %v978_v8, %v978_v8  ;;  %842 = vmatprep.subr.mxu1 %v318_v17  ;;  %v302_v18 = vld [vmem:[%s1361_s1 + $0x178] sm:$0xff]  ;;  %v317_v20 = vld [vmem:[%s1361_s1 + $0x1f0] sm:$0xff]  ;;  %v316_v25 = vld [vmem:[%s1361_s1 + $0x1e8] sm:$0xff]  ;;  %s941_s24 = smov 127   ;;  %vm507_vm4 = vcmask 1041408   ;;  %vm512_vm5 = vcmask 1043456  }
   0x4   :  { %843 = vmatpush3.msra.mxu1 %v302_v18  ;;  %v286_v19 = vld [vmem:[%s1361_s1 + $0xf8] sm:$0xff]  ;;  %v301_v23 = vld [vmem:[%s1361_s1 + $0x170] sm:$0xff]  ;;  %v300_v27 = vld [vmem:[%s1361_s1 + $0x168] sm:$0xff]  ;;  %vm517_vm6 = vcmask 1045504   ;;  %vm684_vm7 = vcmask 523264  }
   0x5   :  { %v973_v7 = vsub.s32 %v35_v5, %v37_v4  ;;  %v270_v22 = vld [vmem:[%s1361_s1 + $0x78] sm:$0xff]  ;;  %804 = vmatprep.subr.mxu0 %v286_v19  ;;  %844 = vmatprep.subr.mxu1 %v317_v20  ;;  %v285_v24 = vld [vmem:[%s1361_s1 + $0xf0] sm:$0xff]  ;;  %v284_v28 = vld [vmem:[%s1361_s1 + $0xe8] sm:$0xff] }
   0x6   :  { %805 = vmatpush3.msra.mxu0 %v270_v22  ;;  %845 = vmatpush3.msra.mxu1 %v301_v23  ;;  %v269_v26 = vld [vmem:[%s1361_s1 + $0x70] sm:$0xff]  ;;  %v315_v29 = vld [vmem:[%s1361_s1 + $0x1e0] sm:$0xff]  ;;  %v268_v30 = vld [vmem:[%s1361_s1 + $0x68] sm:$0xff] }
   0x7   :  { %v982_v9 = vrot.slane %v968_v0, %v973_v7  ;;  %v985_v10 = vrot.slane %v32_v6, %v973_v7  ;;  %v993_v11 = vrot.slane %v978_v8, %v973_v7  ;;  %v1010_v16 = vrot.slane %v145_v13, %v973_v7  ;;  %806 = vmatprep.subr.mxu0 %v285_v24  ;;  %v299_v31 = vld [vmem:[%s1361_s1 + $0x160] sm:$0xff]  ;;  %v314_v33 = vld [vmem:[%s1361_s1 + $0x1d8] sm:$0xff]  ;;  %v313_v37 = vld [vmem:[%s1361_s1 + $0x1d0] sm:$0xff] }
   0x8   :  { %846 = vmatprep.subr.mxu1 %v316_v25  ;;  %807 = vmatpush3.msra.mxu0 %v269_v26  ;;  %v283_v32 = vld [vmem:[%s1361_s1 + $0xe0] sm:$0xff]  ;;  %v298_v35 = vld [vmem:[%s1361_s1 + $0x158] sm:$0xff]  ;;  %v297_v39 = vld [vmem:[%s1361_s1 + $0x150] sm:$0xff] }
   0x9   :  { %66 = vrot.lane.b32.xlu0 %v982_v9, %s940_s16  ;;  %70 = vrot.lane.b32.xlu1 %v985_v10, %s940_s16  ;;  %v997_v12 = vcombine.high %v985_v10, %v985_v10  ;;  %v47_v14 = vcombine.high %v982_v9, %v982_v9  ;;  %v160_v15 = vcombine.high %v993_v11, %v993_v11  ;;  %v267_v34 = vld [vmem:[%s1361_s1 + $0x60] sm:$0xff]  ;;  %v282_v36 = vld [vmem:[%s1361_s1 + $0xd8] sm:$0xff] }
   0xa   :  { %v1028_v21 = vcombine.high %v1010_v16, %v1010_v16  ;;  %847 = vmatpush3.msra.mxu1 %v300_v27  ;;  %808 = vmatprep.subr.mxu0 %v284_v28  ;;  %v266_v38 = vld [vmem:[%s1361_s1 + $0x58] sm:$0xff]  ;;  %v281_v40 = vld [vmem:[%s1361_s1 + $0xd0] sm:$0xff]  ;;  %v312_v41 = vld [vmem:[%s1361_s1 + $0x1c8] sm:$0xff]  ;;  %v1235_v27 = vand.u32 127, %v18_v1 }
   0xb   :  { %848 = vmatprep.subr.mxu1 %v315_v29  ;;  %809 = vmatpush3.msra.mxu0 %v268_v30  ;;  %v265_v42 = vld [vmem:[%s1361_s1 + $0x50] sm:$0xff]  ;;  %v296_v43 = vld [vmem:[%s1361_s1 + $0x148] sm:$0xff]  ;;  %v311_v45 = vld [vmem:[%s1361_s1 + $0x1c0] sm:$0xff] }
   0xc   :  { %849 = vmatpush3.msra.mxu1 %v299_v31  ;;  %810 = vmatprep.subr.mxu0 %v283_v32  ;;  %v280_v44 = vld [vmem:[%s1361_s1 + $0xc8] sm:$0xff]  ;;  %v295_v47 = vld [vmem:[%s1361_s1 + $0x140] sm:$0xff]  ;;  %v310_v49 = vld [vmem:[%s1361_s1 + $0x1b8] sm:$0xff]  ;;  %vm74_vm0 = vcmp.lt.s32.totalorder %v1235_v27, 1  ;;  %vm61_vm1 = vcmp.lt.s32.totalorder %v1235_v27, 127  ;;  %vm23_vm2 = vcmp.eq.s32.totalorder %v1235_v27, 7 }
   0xd   :  { %178 = vrot.lane.b32.xlu0 %v993_v11, %s940_s16  ;;  %72 = vrot.lane.b32.xlu1 %v997_v12, %s940_s16  ;;  %v264_v46 = vld [vmem:[%s1361_s1 + $0x48] sm:$0xff]  ;;  %v279_v48 = vld [vmem:[%s1361_s1 + $0xc0] sm:$0xff]  ;;  %vm27_vm3 = vcmp.eq.s32.totalorder %v1235_v27, 70 }
   0xe   :  { %850 = vmatprep.subr.mxu1 %v314_v33  ;;  %811 = vmatpush3.msra.mxu0 %v267_v34  ;;  %v263_v50 = vld [vmem:[%s1361_s1 + $0x40] sm:$0xff]  ;;  %v294_v51 = vld [vmem:[%s1361_s1 + $0x138] sm:$0xff]  ;;  %v309_v53 = vld [vmem:[%s1361_s1 + $0x1b0] sm:$0xff] }
   0xf   :  { %851 = vmatpush3.msra.mxu1 %v298_v35  ;;  %812 = vmatprep.subr.mxu0 %v282_v36  ;;  %v278_v52 = vld [vmem:[%s1361_s1 + $0xb8] sm:$0xff]  ;;  %v293_v55 = vld [vmem:[%s1361_s1 + $0x130] sm:$0xff]  ;;  %v308_v57 = vld [vmem:[%s1361_s1 + $0x1a8] sm:$0xff] }
  0x10   :  { %852 = vmatprep.subr.mxu1 %v313_v37  ;;  %813 = vmatpush3.msra.mxu0 %v266_v38  ;;  %v262_v54 = vld [vmem:[%s1361_s1 + $0x38] sm:$0xff]  ;;  %v277_v56 = vld [vmem:[%s1361_s1 + $0xb0] sm:$0xff]  ;;  %v292_v59 = vld [vmem:[%s1361_s1 + $0x128] sm:$0xff] }
  0x11   :  { %68 = vrot.lane.b32.xlu0 %v47_v14, %s940_s16  ;;  %180 = vrot.lane.b32.xlu1 %v160_v15, %s940_s16  ;;  %v261_v58 = vld [vmem:[%s1361_s1 + $0x30] sm:$0xff]  ;;  %v276_v60 = vld [vmem:[%s1361_s1 + $0xa8] sm:$0xff] }
  0x12   :  { %853 = vmatpush3.msra.mxu1 %v297_v39  ;;  %814 = vmatprep.subr.mxu0 %v281_v40  ;;  %v307_v61 = vld [vmem:[%s1361_s1 + $0x1a0] sm:$0xff]  ;;  %v260_v62 = vld [vmem:[%s1361_s1 + $0x28] sm:$0xff]  ;;  %v306_v3 = vld [vmem:[%s1361_s1 + $0x198] sm:$0xff] }
  0x13   :  { %854 = vmatprep.subr.mxu1 %v312_v41  ;;  %815 = vmatpush3.msra.mxu0 %v265_v42  ;;  %v291_v63 = vld [vmem:[%s1361_s1 + $0x120] sm:$0xff]  ;;  %v290_v5 = vld [vmem:[%s1361_s1 + $0x118] sm:$0xff]  ;;  %v289_v13 = vld [vmem:[%s1361_s1 + $0x110] sm:$0xff] }
  0x14   :  { %855 = vmatpush3.msra.mxu1 %v296_v43  ;;  %816 = vmatprep.subr.mxu0 %v280_v44  ;;  %v275_v2 = vld [vmem:[%s1361_s1 + $0xa0] sm:$0xff]  ;;  %v274_v6 = vld [vmem:[%s1361_s1 + $0x98] sm:$0xff]  ;;  %v288_v17 = vld [vmem:[%s1361_s1 + $0x108] sm:$0xff] }
  0x15   :  { %182 = vrot.lane.b32.xlu0 %v1010_v16, %s940_s16  ;;  %184 = vrot.lane.b32.xlu1 %v1028_v21, %s940_s16  ;;  %v259_v4 = vld [vmem:[%s1361_s1 + $0x20] sm:$0xff]  ;;  %v272_v18 = vld [vmem:[%s1361_s1 + $0x88] sm:$0xff] }
  0x16   :  { %856 = vmatprep.subr.mxu1 %v311_v45  ;;  %817 = vmatpush3.msra.mxu0 %v264_v46  ;;  %v303_v19 = vld [vmem:[%s1361_s1 + $0x180] sm:$0xff]  ;;  %v256_v20 = vld [vmem:[%s1361_s1 + $0x8] sm:$0xff]  ;;  %v1231_v24 = vld [vmem:[%s1362_s2 + $0x38] sm:$0xff] }
  0x17   :  { %857 = vmatpush3.msra.mxu1 %v295_v47  ;;  %818 = vmatprep.subr.mxu0 %v279_v48  ;;  %v271_v22 = vld [vmem:[%s1361_s1 + $0x80] sm:$0xff] }
  0x18   :  { %858 = vmatprep.subr.mxu1 %v310_v49  ;;  %819 = vmatpush3.msra.mxu0 %v263_v50  ;;  %v255_v23 = vld [vmem:[%s1361_s1] sm:$0xff] }
  0x19   :  { %53 = vrot.lane.b32.xlu0 %v982_v9, %s941_s24  ;;  %55 = vrot.lane.b32.xlu1 %v47_v14, %s941_s24  ;;  %v273_v14 = vld [vmem:[%s1361_s1 + $0x90] sm:$0xff] }
  0x1a   :  { %859 = vmatpush3.msra.mxu1 %v294_v51  ;;  %820 = vmatprep.subr.mxu0 %v278_v52 }
  0x1b   :  { %860 = vmatprep.subr.mxu1 %v309_v53  ;;  %821 = vmatpush3.msra.mxu0 %v262_v54 }
  0x1c   :  { %861 = vmatpush3.msra.mxu1 %v293_v55  ;;  %822 = vmatprep.subr.mxu0 %v277_v56 }
  0x1d   :  { %166 = vrot.lane.b32.xlu0 %v993_v11, %s941_s24  ;;  %168 = vrot.lane.b32.xlu1 %v160_v15, %s941_s24  ;;  %v304_v15 = vld [vmem:[%s1361_s1 + $0x188] sm:$0xff] }
  0x1e   :  { %862 = vmatprep.subr.mxu1 %v308_v57  ;;  %823 = vmatpush3.msra.mxu0 %v261_v58 }
  0x1f   :  { %863 = vmatpush3.msra.mxu1 %v292_v59  ;;  %824 = vmatprep.subr.mxu0 %v276_v60 }
  0x20   :  { %864 = vmatprep.subr.mxu1 %v307_v61  ;;  %825 = vmatpush3.msra.mxu0 %v260_v62 }
  0x21   :  { %57 = vrot.lane.b32.xlu0 %v985_v10, %s941_s24  ;;  %59 = vrot.lane.b32.xlu1 %v997_v12, %s941_s24  ;;  %v305_v10 = vld [vmem:[%s1361_s1 + $0x190] sm:$0xff]  ;;  %v258_v12 = vld [vmem:[%s1361_s1 + $0x18] sm:$0xff] }
  0x22   :  { %865 = vmatpush3.msra.mxu1 %v291_v63  ;;  %826 = vmatprep.subr.mxu0 %v275_v2 }
  0x23   :  { %866 = vmatprep.subr.mxu1 %v306_v3  ;;  %827 = vmatpush3.msra.mxu0 %v259_v4 }
  0x24   :  { %867 = vmatpush3.msra.mxu1 %v290_v5  ;;  %828 = vmatprep.subr.mxu0 %v274_v6 }
  0x25   :  { %170 = vrot.lane.b32.xlu0 %v1010_v16, %s941_s24  ;;  %172 = vrot.lane.b32.xlu1 %v1028_v21, %s941_s24  ;;  %v257_v16 = vld [vmem:[%s1361_s1 + $0x10] sm:$0xff]  ;;  %v287_v21 = vld [vmem:[%s1361_s1 + $0x100] sm:$0xff] }
  0x26   :  { %868 = vmatprep.subr.mxu1 %v305_v10  ;;  %829 = vmatpush3.msra.mxu0 %v258_v12 }
  0x27   :  { %869 = vmatpush3.msra.mxu1 %v289_v13  ;;  %830 = vmatprep.subr.mxu0 %v273_v14 }
  0x28   :  { %870 = vmatprep.subr.mxu1 %v304_v15  ;;  %831 = vmatpush3.msra.mxu0 %v257_v16  ;;  %v319_v16 = vmul.f32 %v968_v0, %v968_v0 }
  0x29   :  { %871 = vmatpush3.msra.mxu1 %v288_v17  ;;  %832 = vmatprep.subr.mxu0 %v272_v18  ;;  %v320_v17 = vmul.f32 %v978_v8, %v978_v8 }
  0x2a   :  { %872 = vmatprep.subr.mxu1 %v303_v19  ;;  %833 = vmatpush3.msra.mxu0 %v256_v20 }
  0x2b   :  { %873 = vmatpush3.msra.mxu1 %v287_v21  ;;  %834 = vmatprep.subr.mxu0 %v271_v22 }
  0x2c   :  { %835 = vmatpush3.msra.mxu0 %v255_v23 }
  0x2d   :  { %890 = vmatprep.subr.mxu0 %v1231_v24 }
  0x7b   :  { %v67_v25 = vpop.permute.xlu0 %66  ;;  %v71_v26 = vpop.permute.xlu1 %70 }
  0x7f   :  { %v179_v28 = vpop.permute.xlu0 %178  ;;  %v73_v29 = vpop.permute.xlu1 %72 }
  0x80   :  { %v75_v32 = vsel %vm74_vm0, %v71_v26, %v73_v29  ;;  %v78_v33 = vsel %vm74_vm0, %v73_v29, %v67_v25 }
  0x83   :  { %v69_v30 = vpop.permute.xlu0 %68  ;;  %v181_v31 = vpop.permute.xlu1 %180 }
  0x84   :  { %v76_v34 = vsel %vm74_vm0, %v69_v30, %v71_v26  ;;  %v77_v35 = vsel %vm74_vm0, %v67_v25, %v69_v30  ;;  %v188_v44 = vsel %vm74_vm0, %v179_v28, %v181_v31 }
  0x85   :  { %v99_v1 = vcombine.low %v78_v33, %v77_v35  ;;  %v100_v36 = vcombine.low %v76_v34, %v75_v32 }
  0x87   :  { %v183_v37 = vpop.permute.xlu0 %182  ;;  %v185_v38 = vpop.permute.xlu1 %184  ;;  %v107_v42 = vrot.slane %v99_v1, %v973_v7  ;;  %v114_v43 = vrot.slane %v100_v36, %v973_v7  ;;  %v321_v36 = vadd.f32 %v320_v17, %v319_v16 }
  0x88   :  { %v187_v39 = vsel %vm74_vm0, %v181_v31, %v183_v37  ;;  %v1250_v40 = vsel %vm74_vm0, %v183_v37, %v185_v38  ;;  %v189_v41 = vsel %vm74_vm0, %v185_v38, %v179_v28 }
  0x89   :  { %v210_v45 = vcombine.low %v189_v41, %v188_v44  ;;  %v211_v46 = vcombine.low %v187_v39, %v1250_v40  ;;  %v115_v50 = vcombine.low %v107_v42, %v114_v43 }
  0x8b   :  { %v54_v47 = vpop.permute.xlu0 %53  ;;  %v56_v48 = vpop.permute.xlu1 %55  ;;  %v218_v52 = vrot.slane %v210_v45, %v973_v7  ;;  %v225_v53 = vrot.slane %v211_v46, %v973_v7  ;;  %v117_v58 = vsub.f32 %v968_v0, %v115_v50  ;;  %v376_v46 = vcombine.high %v321_v36, %v321_v36 }
  0x8c   :  { %v64_v49 = vsel %vm61_vm1, %v54_v47, %v56_v48 }
  0x8d   :  { %v79_v51 = vsub.f32 %v64_v49, %v78_v33  ;;  %v87_v59 = vsub.f32 %v64_v49, %v982_v9  ;;  %v226_v61 = vcombine.low %v218_v52, %v225_v53  ;;  %v126_v10 = vrot.slane %v117_v58, %v973_v7 }
  0x8e   :  { %v390_v49 = vrot.slane %v376_v46, %v973_v7 }
  0x8f   :  { %v83_v54 = vmul.f32 0.5, %v79_v51  ;;  %v167_v55 = vpop.permute.xlu0 %166  ;;  %v169_v56 = vpop.permute.xlu1 %168  ;;  %v228_v14 = vsub.f32 %v978_v8, %v226_v61 }
  0x90   :  { %v176_v57 = vsel %vm61_vm1, %v167_v55, %v169_v56 }
  0x91   :  { %v190_v60 = vsub.f32 %v176_v57, %v189_v41  ;;  %v91_v62 = vsel %vm23_vm2, %v87_v59, %v83_v54  ;;  %v198_v15 = vsub.f32 %v176_v57, %v993_v11  ;;  %v237_v33 = vrot.slane %v228_v14, %v973_v7 }
  0x92   :  { %v140_v19 = vsel %vm27_vm3, %v126_v10, %v91_v62  ;;  %v383_v54 = vrot.slane %v321_v36, %v973_v7  ;;  %v392_v57 = vcombine.high %v390_v49, %v390_v49 }
  0x93   :  { %v58_v63 = vpop.permute.xlu0 %57  ;;  %v60_v2 = vpop.permute.xlu1 %59  ;;  %v194_v3 = vmul.f32 0.5, %v190_v60 }
  0x94   :  { %v63_v4 = vsel %vm61_vm1, %v56_v48, %v58_v63  ;;  %v62_v5 = vsel %vm61_vm1, %v58_v63, %v60_v2  ;;  %v65_v6 = vsel %vm61_vm1, %v60_v2, %v54_v47 }
  0x95   :  { %v80_v9 = vsub.f32 %v63_v4, %v77_v35  ;;  %v81_v12 = vsub.f32 %v62_v5, %v76_v34  ;;  %v82_v13 = vsub.f32 %v65_v6, %v75_v32  ;;  %v202_v25 = vsel %vm23_vm2, %v198_v15, %v194_v3 }
  0x96   :  { %v251_v41 = vsel %vm27_vm3, %v237_v33, %v202_v25 }
  0x97   :  { %v84_v18 = vmul.f32 0.5, %v80_v9  ;;  %v85_v20 = vmul.f32 0.5, %v81_v12  ;;  %v86_v21 = vmul.f32 0.5, %v82_v13  ;;  %v171_v22 = vpop.permute.xlu0 %170  ;;  %v173_v23 = vpop.permute.xlu1 %172 }
  0x98   :  { %v175_v11 = vsel %vm61_vm1, %v169_v56, %v171_v22  ;;  %v174_v26 = vsel %vm61_vm1, %v171_v22, %v173_v23  ;;  %v177_v28 = vsel %vm61_vm1, %v173_v23, %v167_v55 }
  0x99   :  { %v326_v29 = vcombine.low %v140_v19, %v84_v18  ;;  %v327_v30 = vcombine.low %v85_v20, %v86_v21  ;;  %v191_v31 = vsub.f32 %v175_v11, %v188_v44  ;;  %v192_v32 = vsub.f32 %v174_v26, %v187_v39 }
  0x9a   :  { %v193_v34 = vsub.f32 %v177_v28, %v1250_v40  ;;  %v372_v39 = vmul.f32 %v321_v36, %v321_v36 }
  0x9b   :  { %v195_v35 = vmul.f32 0.5, %v191_v31  ;;  %v196_v1 = vmul.f32 0.5, %v192_v32  ;;  %v334_v37 = vrot.slane %v326_v29, %v973_v7  ;;  %v341_v38 = vrot.slane %v327_v30, %v973_v7 }
  0x9c   :  { %v197_v42 = vmul.f32 0.5, %v193_v34  ;;  %v442_v50 = vcombine.low %v372_v39, %v372_v39  ;;  %v456_v58 = vrot.slane %v372_v39, %v973_v7  ;;  %v676_v39 = vld [vmem:[%s1362_s2] sm:$0xff] }
  0x9d   :  { %v349_v43 = vcombine.low %v251_v41, %v195_v35  ;;  %v342_v47 = vcombine.low %v334_v37, %v341_v38  ;;  %v682_v35 = vld [vmem:[%s1362_s2 + $0x30] sm:$0xff] }
  0x9e   :  { %v350_v45 = vcombine.low %v196_v1, %v197_v42  ;;  %v449_v59 = vrot.slane %v442_v50, %v973_v7  ;;  %v458_v6 = vcombine.low %v456_v58, %v456_v58 }
  0x9f   :  { %v357_v44 = vrot.slane %v349_v43, %v973_v7  ;;  %v344_v51 = vmul.f32 %v342_v47, %v968_v0  ;;  %v370_v52 = vmul.f32 %v978_v8, %v342_v47  ;;  %v681_v43 = vld [vmem:[%s1362_s2 + $0x28] sm:$0xff] }
  0xa0   :  { %v364_v40 = vrot.slane %v350_v45, %v973_v7  ;;  %v457_v20 = vcombine.low %v449_v59, %v449_v59  ;;  %v678_v45 = vld [vmem:[%s1362_s2 + $0x10] sm:$0xff] }
  0xa2   :  { %v365_v48 = vcombine.low %v357_v44, %v364_v40  ;;  %v677_v44 = vld [vmem:[%s1362_s2 + $0x8] sm:$0xff] }
  0xa4   :  { %v367_v27 = vmul.f32 %v978_v8, %v365_v48  ;;  %v369_v53 = vmul.f32 %v365_v48, %v968_v0  ;;  %v391_v8 = vcombine.high %v383_v54, %v383_v54 }
  0xa6   :  { %v368_v55 = vadd.f32 %v367_v27, %v344_v51  ;;  %v371_v56 = vsub.f32 %v369_v53, %v370_v52 }
  0xa8   :  { %v412_v60 = vrot.slane %v368_v55, %v973_v7  ;;  %v420_v61 = vcombine.high %v371_v56, %v371_v56  ;;  %v398_v62 = vcombine.low %v368_v55, %v368_v55  ;;  %v427_v63 = vrot.slane %v371_v56, %v973_v7 }
  0xa9   :  { %v373_v2 = vmul.f32 %v368_v55, %v368_v55  ;;  %v374_v0 = vmul.f32 %v371_v56, %v371_v56 }
  0xaa   :  { %v414_v3 = vcombine.high %v412_v60, %v412_v60  ;;  %v434_v4 = vrot.slane %v420_v61, %v973_v7  ;;  %v405_v5 = vrot.slane %v398_v62, %v973_v7  ;;  %v435_v12 = vcombine.low %v427_v63, %v427_v63 }
  0xab   :  { %v464_v9 = vcombine.high %v373_v2, %v373_v2  ;;  %v500_v10 = vrot.slane %v374_v0, %v973_v7  ;;  %v510_v18 = vsel %vm507_vm4, %v390_v49, %v412_v60  ;;  %v471_v31 = vrot.slane %v373_v2, %v973_v7 }
  0xac   :  { %v511_v13 = vsel %vm507_vm4, %v392_v57, %v414_v3  ;;  %v436_v14 = vcombine.low %v434_v4, %v434_v4  ;;  %v413_v15 = vcombine.high %v405_v5, %v405_v5  ;;  %v508_v16 = vsel %vm507_vm4, %v383_v54, %v405_v5 }
  0xad   :  { %v516_v17 = vsel %vm512_vm5, %v511_v13, %v434_v4  ;;  %v478_v19 = vrot.slane %v464_v9, %v973_v7  ;;  %v513_v25 = vsel %vm512_vm5, %v508_v16, %v435_v12  ;;  %v502_v29 = vcombine.high %v500_v10, %v500_v10 }
  0xae   :  { %v521_v21 = vsel %vm517_vm6, %v516_v17, %v456_v58  ;;  %v515_v22 = vsel %vm512_vm5, %v510_v18, %v436_v14  ;;  %v509_v23 = vsel %vm507_vm4, %v391_v8, %v413_v15  ;;  %v486_v32 = vcombine.low %v374_v0, %v374_v0 }
  0xaf   :  { %665 = vmatprep.mubr.f32.mxu1 %v521_v21  ;;  %v520_v11 = vsel %vm517_vm6, %v515_v22, %v458_v6  ;;  %v514_v26 = vsel %vm512_vm5, %v509_v23, %v427_v63  ;;  %v480_v28 = vcombine.high %v478_v19, %v478_v19  ;;  %v518_v34 = vsel %vm517_vm6, %v513_v25, %v457_v20 }
  0xb0   :  { %666 = vmatmul.mubr.f32.vlgmr.msra.gmra.mxu1 %v520_v11  ;;  %v519_v30 = vsel %vm517_vm6, %v514_v26, %v449_v59  ;;  %v493_v1 = vrot.slane %v486_v32, %v973_v7  ;;  %v524_v36 = vsel %vm507_vm4, %v478_v19, %v500_v10  ;;  %v479_v37 = vcombine.high %v471_v31, %v471_v31  ;;  %v680_v7 = vld [vmem:[%s1362_s2 + $0x20] sm:$0xff] }
  0xb1   :  { %590 = vmatprep.mubr.f32.mxu0 %v519_v30  ;;  %v525_v33 = vsel %vm507_vm4, %v480_v28, %v502_v29 }
  0xb2   :  { %670 = vmatprep.mubr.f32.mxu1 %v525_v33  ;;  %591 = vmatmul.mubr.f32.vlgmr.msra.gmra.mxu0 %v518_v34  ;;  %v501_v38 = vcombine.high %v493_v1, %v493_v1  ;;  %v522_v42 = vsel %vm507_vm4, %v471_v31, %v493_v1 }
  0xb3   :  { %891 = vmatpush3.msra.mxu0 %v1231_v24  ;;  %v679_v24 = vld [vmem:[%s1362_s2 + $0x18] sm:$0xff]  ;;  %s942_s2 = smov [#allocation2]  }
  0xb4   :  { %671 = vmatmul.mubr.f32.gmra.mxu1 %v524_v36  ;;  %892 = vmatprep.subr.mxu0 %v682_v35  ;;  %v523_v41 = vsel %vm507_vm4, %v479_v37, %v501_v38  ;;  %s790_s16 = sshll.u32 %s942_s2, 4  ;;  %s791_s16 = int_to_ptr.vmem [resolvable:$true] %s790_s16 }
  0xb5   :  { %893 = vmatpush3.msra.mxu0 %v682_v35  ;;  %595 = vmatprep.mubr.f32.mxu0 %v523_v41  ;;  %s917_s21 = scalar_lea.vmem %s791_s16, 192  ;;  %p922_p1 = scmp.lt.s32.totalorder %s791_s16, %s791_s16 }
  0xb6   :  { %596 = vmatmul.mubr.f32.gmra.mxu0 %v522_v42  ;;  %894 = vmatprep.subr.mxu0 %v681_v43  ;;  %p918_p0 = scmp.ne.s32.totalorder %s791_s16, %s917_s21  ;;  %p923_p2 = scmp.lt.s32.totalorder %s917_s21, %s917_s21 }
  0xb7   :  { %895 = vmatpush3.msra.mxu0 %v681_v43 }
  0xb8   :  { %896 = vmatprep.subr.mxu0 %v680_v7  ;;  %p924_p3 = por %p923_p2, %p922_p1 }
  0xb9   :  { %897 = vmatpush3.msra.mxu0 %v680_v7 }
  0xba   :  { %898 = vmatprep.subr.mxu0 %v679_v24  ;;  %p925_p4 = pnand %p924_p3, %p918_p0 }
  0xbb   :  { %899 = vmatpush3.msra.mxu0 %v679_v24 }
  0xbc   :  { %900 = vmatprep.subr.mxu0 %v678_v45 }
  0xbd   :  { %901 = vmatpush3.msra.mxu0 %v678_v45 }
  0xbe   :  { %902 = vmatprep.subr.mxu0 %v677_v44 }
  0xbf   :  { %903 = vmatpush3.msra.mxu0 %v677_v44 }
  0xc0   :  { %904 = vmatprep.subr.mxu0 %v676_v39 }
  0xc1   :  { %905 = vmatpush3.msra.mxu0 %v676_v39 }
 0x170   :  { %v874_v46 = vpop.f32.mrf.mxu1 }
 0x172   :  { %v836_v47 = vpop.f32.mrf.mxu0  ;;  %v875_v40 = vpop.f32.mrf.mxu1 }
 0x173   :  { %v876_v50 = vadd.f32 %v875_v40, %v874_v46 }
 0x174   :  { %v837_v48 = vpop.f32.mrf.mxu0  ;;  %v877_v49 = vpop.f32.mrf.mxu1 }
 0x175   :  { %v838_v51 = vadd.f32 %v837_v48, %v836_v47 }
 0x176   :  { %v839_v27 = vpop.f32.mrf.mxu0  ;;  %v878_v53 = vpop.f32.mrf.mxu1 }
 0x177   :  { %v668_v52 = vadd.f32 %v876_v50, %v838_v51  ;;  %v879_v55 = vadd.f32 %v878_v53, %v877_v49 }
 0x178   :  { %v840_v54 = vpop.f32.mrf.mxu0 }
 0x179   :  { %906 = vmatprep.mubr.msk.f32.mxu0 %vm684_vm7, %v668_v52  ;;  %v841_v56 = vadd.f32 %v840_v54, %v839_v27 }
 0x17b   :  { %v673_v57 = vadd.f32 %v879_v55, %v841_v56 }
 0x17d   :  { %907 = vmatmul.mubr.msk.f32.vlgmr.msra.gmra.mxu0 %vm684_vm7, %v673_v57 }
 0x23d   :  { %v908_v58 = vpop.f32.mrf.mxu0 }
 0x23f   :  { %v757_v59 = vpop.f32.mrf.mxu0 }
 0x240   :  { %766 = vst [vmem:[#allocation2] sm:$0x3] %v757_v59  ;;  %v767_v60 = vmul.f32 %v757_v59, %v757_v59  ;;  %776 = vst [vmem:[#allocation2] sm:$0xc] %v757_v59 }
 0x241   :  { %782 = vst [vmem:[#allocation2] sm:$0x30] %v757_v59 }
 0x242   :  { %v769_v61 = vrot.slane %v767_v60, 2 }
 0x244   :  { %v771_v62 = vsub.f32 %v757_v59, %v769_v61  ;;  %v777_v63 = vsub.f32 %v908_v58, %v769_v61 }
 0x246   :  { %v772_v8 = vmax.f32 %v771_v62, 1e-08  ;;  %v778_v2 = vmax.f32 %v777_v63, 1e-08 }
 0x248   :  { %774 = vst [vmem:[#allocation2] sm:$0xc0] %v772_v8  ;;  %780 = vst [vmem:[#allocation2 + $0x8] sm:$0xf] %v778_v2  }
 0x249   :  { %928 = shalt.err (!%p925_p4)
}
 0x24a   :  { %s943_s22 = smov 32   ;;  %s944_s23 = smov 2  }
 0x24b   :  { %796 = dma.vmem_to_hbm [thread:$0]  %s791_s16, 192, %s1363_s3, [#allocation3], %s943_s22, %s943_s22, %s944_s23  }
 0x24c   :  { %937 = dma.done.wait [#allocation3], 192  }
 0x24d   :  { %938 = vsyncadd [#allocation3], 4294967104 }
 0x24e   :  { %800 = vsyncpa [#allocation3], 1 }

</bundles_post_ra>
